<compile_context>
chip_gen: v7x
topology: tpu7x:2x2x1
jax: 0.10.0
libtpu: 0.0.40
codegen_flags: <defaults>
</compile_context>

<pallas_src>
import functools
import math

import jax
import jax.numpy as jnp
from jax.experimental import pallas as pl
from jax.experimental.pallas import tpu as pltpu

_BN_EPS = 1e-5
_LANE = 128


def _round_up(x, m):
    return (x + m - 1) // m * m


# ----------------------------- fused block kernel ----------------------------

def _temporal_block_kernel(*refs, k, dilation, pad, pad_al, tile_l, slope,
                           has_downsample, carry_halo):
    """One TemporalBlock on a (1, tile_l, C) time tile.

    conv1(dilated causal)+BN1+LeakyReLU -> conv2(dilated causal)+BN2+LeakyReLU
    -> + residual (identity or fused 1x1 downsample conv) -> ReLU.
    The causal left-halo (last `pad_al` rows of the previous time tile, for
    both x and the intermediate h1) is carried in VMEM scratch.
    """
    if has_downsample:
        (x_ref, w1_ref, s1_ref, sh1_ref, w2_ref, s2_ref, sh2_ref,
         wds_ref, bds_ref, o_ref, xh_ref, hh_ref) = refs
    else:
        (x_ref, w1_ref, s1_ref, sh1_ref, w2_ref, s2_ref, sh2_ref,
         o_ref, xh_ref, hh_ref) = refs
        wds_ref = bds_ref = None

    t = pl.program_id(1)

    @pl.when(t == 0)                      # first time tile of this batch row:
    def _():                              # causal halo is all zeros
        xh_ref[...] = jnp.zeros_like(xh_ref)
        hh_ref[...] = jnp.zeros_like(hh_ref)

    def dilated_conv(win, w_ref):
        # win: (pad_al + tile_l, C) bf16 ; w_ref: (k*C, Cout) bf16 (tap-stacked)
        taps = [win[pad_al - pad + j * dilation:
                    pad_al - pad + j * dilation + tile_l, :]
                for j in range(k)]
        xcat = taps[0] if k == 1 else jnp.concatenate(taps, axis=-1)
        return jnp.dot(xcat, w_ref[...], preferred_element_type=jnp.float32)

    x_tile = x_ref[0]                                       # (tile_l, Cin_p)

    # conv1 -> chomp1 -> batchnorm1 (bias folded) -> LeakyReLU (dropout = id)
    x_win = jnp.concatenate([xh_ref[...], x_tile], axis=0)
    h1 = dilated_conv(x_win, w1_ref) * s1_ref[...] + sh1_ref[...]
    h1 = jnp.where(h1 > 0, h1, slope * h1)
    h1_bf = h1.astype(jnp.bfloat16)

    # conv2 -> chomp2 -> batchnorm2 (bias folded) -> LeakyReLU (dropout = id)
    h1_win = jnp.concatenate([hh_ref[...], h1_bf], axis=0)
    h2 = dilated_conv(h1_win, w2_ref) * s2_ref[...] + sh2_ref[...]
    h2 = jnp.where(h2 > 0, h2, slope * h2)

    # residual (fused 1x1 downsample conv if channel counts differ) -> ReLU
    if has_downsample:
        res = jnp.dot(x_tile, wds_ref[...],
                      preferred_element_type=jnp.float32) + bds_ref[...]
    else:
        res = x_tile.astype(jnp.float32)
    o_ref[0] = jnp.maximum(h2 + res, 0.0).astype(o_ref.dtype)

    if carry_halo:        # save trailing rows as the next tile's causal halo
        xh_ref[...] = x_ref[0, pl.ds(tile_l - pad_al, pad_al), :]
        hh_ref[...] = h1_bf[tile_l - pad_al:, :]


# --------------------------------- wrappers ----------------------------------

def _choose_tile_l(L, cap):
    if L <= cap:
        return L
    t = cap - cap % 8
    while t >= 8:
        if L % t == 0:
            return t
        t -= 8
    return L            # no 8-aligned divisor: fall back to a single time tile


def _const_spec(shape):
    zeros = (0,) * len(shape)
    return pl.BlockSpec(shape, lambda b, t: zeros)   # resident weights/params


def temporal_block_forward(x_blc, lyr, *, slope, tile_cap=1024):
    """x_blc: (B, L, Cin_p) bf16, lane-padded channels -> (B, L, Cout_p) bf16."""
    B, L, cin_p = x_blc.shape
    cout_p = lyr["w1"].shape[-1]
    k, d = lyr["k"], lyr["dilation"]
    pad = (k - 1) * d
    pad_al = max(8, _round_up(pad, 8))        # sublane-aligned halo row count

    tile_l = _choose_tile_l(L, tile_cap)
    if tile_l < L and pad_al > tile_l:        # halo must fit in one prior tile
        tile_l = L
    n_t = L // tile_l

    args = [x_blc, lyr["w1"], lyr["s1"], lyr["sh1"],
            lyr["w2"], lyr["s2"], lyr["sh2"]]
    has_ds = lyr["w_ds"] is not None
    if has_ds:
        args += [lyr["w_ds"], lyr["b_ds"]]

    in_specs = [pl.BlockSpec((1, tile_l, cin_p), lambda b, t: (b, t, 0))]
    in_specs += [_const_spec(a.shape) for a in args[1:]]

    kernel = functools.partial(
        _temporal_block_kernel, k=k, dilation=d, pad=pad, pad_al=pad_al,
        tile_l=tile_l, slope=slope, has_downsample=has_ds,
        carry_halo=n_t > 1)

    return pl.pallas_call(
        kernel,
        out_shape=jax.ShapeDtypeStruct((B, L, cout_p), jnp.bfloat16),
        grid=(B, n_t),
        in_specs=in_specs,
        out_specs=pl.BlockSpec((1, tile_l, cout_p), lambda b, t: (b, t, 0)),
        scratch_shapes=[pltpu.VMEM((pad_al, cin_p), jnp.bfloat16),
                        pltpu.VMEM((pad_al, cout_p), jnp.bfloat16)],
        compiler_params=pltpu.CompilerParams(
            # Batch tiles are independent (shard across v7x's 2 TCs); time is
            # sequential because of the carried causal halo.
            dimension_semantics=("parallel", "arbitrary"),
            vmem_limit_bytes=48 * 1024 * 1024),
    )(*args)


# ------------------------- parameter initialization --------------------------

def _init_conv_raw(key, cin, cout, ksize):
    kw, kb = jax.random.split(key)
    fan_in = cin * ksize
    # nn.init.kaiming_normal_(weight, nonlinearity='relu'): std = sqrt(2/fan_in)
    w = jax.random.normal(kw, (cout, cin, ksize), jnp.float32) * math.sqrt(
        2.0 / fan_in)
    # PyTorch Conv1d default bias init: U(-1/sqrt(fan_in), 1/sqrt(fan_in))
    bound = 1.0 / math.sqrt(fan_in)
    b = jax.random.uniform(kb, (cout,), jnp.float32, -bound, bound)
    return w, b


def _stack_conv_weight(w, cin_p, cout_p):
    """(Cout, Cin, k) -> tap-stacked (k*Cin_p, Cout_p) bf16 with zero padding."""
    cout, cin, k = w.shape
    w_taps = jnp.transpose(w, (2, 1, 0))                    # (k, Cin, Cout)
    w_taps = jnp.pad(w_taps, ((0, 0), (0, cin_p - cin), (0, cout_p - cout)))
    return w_taps.reshape(k * cin_p, cout_p).astype(jnp.bfloat16)


def _bn_scale_shift(bias, cout, cout_p):
    """Eval-mode BatchNorm scale/shift with the conv bias folded into the shift."""
    gamma = jnp.ones((cout,), jnp.float32)
    beta = jnp.zeros((cout,), jnp.float32)
    mean = jnp.zeros((cout,), jnp.float32)
    var = jnp.ones((cout,), jnp.float32)
    scale = gamma / jnp.sqrt(var + _BN_EPS)
    shift = beta - mean * scale + bias * scale              # conv bias folded
    scale = jnp.pad(scale, (0, cout_p - cout)).reshape(1, cout_p)
    shift = jnp.pad(shift, (0, cout_p - cout)).reshape(1, cout_p)
    return scale, shift


def init_tcn_params(key, num_inputs, num_channels, kernel_size):
    layers = []
    for i, cout in enumerate(num_channels):
        cin = num_inputs if i == 0 else num_channels[i - 1]
        cin_p, cout_p = _round_up(cin, _LANE), _round_up(cout, _LANE)
        dilation = 2 ** i
        key, k1, k2, k3 = jax.random.split(key, 4)
        w1, b1 = _init_conv_raw(k1, cin, cout, kernel_size)
        w2, b2 = _init_conv_raw(k2, cout, cout, kernel_size)
        s1, sh1 = _bn_scale_shift(b1, cout, cout_p)
        s2, sh2 = _bn_scale_shift(b2, cout, cout_p)
        if cin != cout:
            wds_raw, bds_raw = _init_conv_raw(k3, cin, cout, 1)
            wds = _stack_conv_weight(wds_raw, cin_p, cout_p)     # (Cin_p, Cout_p)
            bds = jnp.pad(bds_raw, (0, cout_p - cout)).reshape(1, cout_p)
        else:
            wds_raw = bds_raw = wds = bds = None
        layers.append(dict(
            k=kernel_size, dilation=dilation, cout=cout,
            w1=_stack_conv_weight(w1, cin_p, cout_p), s1=s1, sh1=sh1,
            w2=_stack_conv_weight(w2, cout_p, cout_p), s2=s2, sh2=sh2,
            w_ds=wds, b_ds=bds,
            raw=dict(w1=w1, b1=b1, w2=w2, b2=b2, wds=wds_raw, bds=bds_raw)))
    return layers


# -------------------------------- forward pass -------------------------------

def temporal_conv_net(x_ncl, layers, *, leaky_slope):
    B, c_in, L = x_ncl.shape
    cin_p = _round_up(c_in, _LANE)
    h = jnp.transpose(x_ncl, (0, 2, 1)).astype(jnp.bfloat16)      # NCL -> BLC
    h = jnp.pad(h, ((0, 0), (0, 0), (0, cin_p - c_in)))           # lane padding
    for lyr in layers:
        h = temporal_block_forward(h, lyr, slope=leaky_slope)
    h = h[:, :, :layers[-1]["cout"]].astype(jnp.float32)
    return jnp.transpose(h, (0, 2, 1))                            # BLC -> NCL


# -------------------------- pure-JAX f32 reference ---------------------------

def _reference_forward(x_ncl, layers, slope):
    bn_scale = 1.0 / math.sqrt(1.0 + _BN_EPS)

    def causal_conv(x, w, b, d):                # x (B,L,Cin), w (Cout,Cin,k)
        k = w.shape[-1]
        p = (k - 1) * d
        xp = jnp.pad(x, ((0, 0), (p, 0), (0, 0)))
        acc = jnp.zeros(x.shape[:2] + (w.shape[0],), jnp.float32)
        for j in range(k):
            acc = acc + jnp.einsum('blc,oc->blo',
                                   xp[:, j * d:j * d + x.shape[1], :],
                                   w[:, :, j])
        return acc + b

    h = jnp.transpose(x_ncl, (0, 2, 1))
    for lyr in layers:
        raw, d = lyr["raw"], lyr["dilation"]
        x_in = h
        y = causal_conv(h, raw["w1"], raw["b1"], d) * bn_scale
        y = jnp.where(y > 0, y, slope * y)
        y = causal_conv(y, raw["w2"], raw["b2"], d) * bn_scale
        y = jnp.where(y > 0, y, slope * y)
        if raw["wds"] is not None:
            res = jnp.einsum('blc,oc->blo', x_in, raw["wds"][:, :, 0]) + raw["bds"]
        else:
            res = x_in
        h = jnp.maximum(y + res, 0.0)
    return jnp.transpose(h, (0, 2, 1))


if __name__ == "__main__":
    key = jax.random.PRNGKey(0)
    B, C_in, L = 2, 4, 16
    num_channels = [8, 8]
    kernel_size = 3
    leaky_slope = 0.01

    k_x, k_p = jax.random.split(key)
    x = jax.random.normal(k_x, (B, C_in, L), jnp.float32)    # PyTorch NCL layout
    params = init_tcn_params(k_p, C_in, num_channels, kernel_size)

    out = jax.block_until_ready(
        temporal_conv_net(x, params, leaky_slope=leaky_slope))

    assert out.shape == (B, num_channels[-1], L), out.shape
    assert bool(jnp.all(jnp.isfinite(out)))
    assert bool(jnp.all(out >= 0.0))                         # final ReLU

    ref = _reference_forward(x, params, leaky_slope)
    err = float(jnp.max(jnp.abs(out - ref)))
    assert err < 0.1, f"max abs error vs f32 reference: {err}"
    print("KERNEL_OK")
</pallas_src>

<mosaic_0001>
module attributes {stable_mosaic.version = 11 : i64} {
  func.func @_temporal_block_kernel(%arg0: i32, %arg1: i32, %arg2: memref<1x16x128xbf16, #tpu.memory_space<vmem>>, %arg3: memref<384x128xbf16, #tpu.memory_space<vmem>>, %arg4: memref<1x128xf32, #tpu.memory_space<vmem>>, %arg5: memref<1x128xf32, #tpu.memory_space<vmem>>, %arg6: memref<384x128xbf16, #tpu.memory_space<vmem>>, %arg7: memref<1x128xf32, #tpu.memory_space<vmem>>, %arg8: memref<1x128xf32, #tpu.memory_space<vmem>>, %arg9: memref<128x128xbf16, #tpu.memory_space<vmem>>, %arg10: memref<1x128xf32, #tpu.memory_space<vmem>>, %arg11: memref<1x16x128xbf16, #tpu.memory_space<vmem>>, %arg12: memref<8x128xbf16, #tpu.memory_space<vmem>>, %arg13: memref<8x128xbf16, #tpu.memory_space<vmem>>) attributes {dimension_semantics = [#tpu.dimension_semantics<parallel>, #tpu.dimension_semantics<arbitrary>], iteration_bounds = array<i64: 2, 1>, scalar_prefetch = 0 : i64, scratch_operands = 2 : i64, tpu.core_type = #tpu.core_type<tc>, window_params = [{transform_indices = @transform_0, window_bounds = array<i64: 1, 16, 128>}, {pipeline_mode = #tpu.pipeline_mode<synchronous>, transform_indices = @transform_1, window_bounds = array<i64: 384, 128>}, {pipeline_mode = #tpu.pipeline_mode<synchronous>, transform_indices = @transform_2, window_bounds = array<i64: 1, 128>}, {pipeline_mode = #tpu.pipeline_mode<synchronous>, transform_indices = @transform_3, window_bounds = array<i64: 1, 128>}, {pipeline_mode = #tpu.pipeline_mode<synchronous>, transform_indices = @transform_4, window_bounds = array<i64: 384, 128>}, {pipeline_mode = #tpu.pipeline_mode<synchronous>, transform_indices = @transform_5, window_bounds = array<i64: 1, 128>}, {pipeline_mode = #tpu.pipeline_mode<synchronous>, transform_indices = @transform_6, window_bounds = array<i64: 1, 128>}, {pipeline_mode = #tpu.pipeline_mode<synchronous>, transform_indices = @transform_7, window_bounds = array<i64: 128, 128>}, {pipeline_mode = #tpu.pipeline_mode<synchronous>, transform_indices = @transform_8, window_bounds = array<i64: 1, 128>}, {transform_indices = @transform_9, window_bounds = array<i64: 1, 16, 128>}]} {
    %c0_i32 = arith.constant 0 : i32
    %0 = arith.cmpi eq, %arg1, %c0_i32 : i32
    %1 = arith.extui %0 : i1 to i32
    %c0_i32_0 = arith.constant 0 : i32
    %2 = arith.cmpi ne, %1, %c0_i32_0 : i32
    scf.if %2 {
      %cst_33 = arith.constant 0.000000e+00 : bf16
      %56 = vector.broadcast %cst_33 : bf16 to vector<8x128xbf16>
      %c0_34 = arith.constant 0 : index
      %c0_35 = arith.constant 0 : index
      %57 = vector.load %arg12[%c0_34, %c0_35] : memref<8x128xbf16, #tpu.memory_space<vmem>>, vector<8x128xbf16>
      tpu.vector_store %arg12[%c0_34, %c0_35], %56 {strides = array<i32>} : memref<8x128xbf16, #tpu.memory_space<vmem>>, vector<8x128xbf16>,
      %cst_36 = arith.constant 0.000000e+00 : bf16
      %58 = vector.broadcast %cst_36 : bf16 to vector<8x128xbf16>
      %c0_37 = arith.constant 0 : index
      %c0_38 = arith.constant 0 : index
      %59 = vector.load %arg13[%c0_37, %c0_38] : memref<8x128xbf16, #tpu.memory_space<vmem>>, vector<8x128xbf16>
      tpu.vector_store %arg13[%c0_37, %c0_38], %58 {strides = array<i32>} : memref<8x128xbf16, #tpu.memory_space<vmem>>, vector<8x128xbf16>,
    } else {
    }
    %c0 = arith.constant 0 : index
    %c0_1 = arith.constant 0 : index
    %c0_2 = arith.constant 0 : index
    %3 = vector.load %arg2[%c0, %c0_1, %c0_2] : memref<1x16x128xbf16, #tpu.memory_space<vmem>>, vector<1x16x128xbf16>
    %4 = vector.shape_cast %3 : vector<1x16x128xbf16> to vector<16x128xbf16>
    %c0_3 = arith.constant 0 : index
    %c0_4 = arith.constant 0 : index
    %5 = vector.load %arg12[%c0_3, %c0_4] : memref<8x128xbf16, #tpu.memory_space<vmem>>, vector<8x128xbf16>
    %6 = tpu.concatenate %5, %4 in 0 : vector<8x128xbf16>, vector<16x128xbf16> -> vector<24x128xbf16>
    %7 = vector.extract_strided_slice %6 {offsets = [6, 0], sizes = [16, 128], strides = [1, 1]} : vector<24x128xbf16> to vector<16x128xbf16>
    %8 = vector.extract_strided_slice %6 {offsets = [7, 0], sizes = [16, 128], strides = [1, 1]} : vector<24x128xbf16> to vector<16x128xbf16>
    %9 = vector.extract_strided_slice %6 {offsets = [8, 0], sizes = [16, 128], strides = [1, 1]} : vector<24x128xbf16> to vector<16x128xbf16>
    %10 = tpu.concatenate %7, %8, %9 in 1 : vector<16x128xbf16>, vector<16x128xbf16>, vector<16x128xbf16> -> vector<16x384xbf16>
    %c0_5 = arith.constant 0 : index
    %c0_6 = arith.constant 0 : index
    %11 = vector.load %arg3[%c0_5, %c0_6] : memref<384x128xbf16, #tpu.memory_space<vmem>>, vector<384x128xbf16>
    %cst = arith.constant dense<0.000000e+00> : vector<16x128xf32>
    %12 = tpu.matmul %10, %11, %cst {dimension_numbers = #tpu.dot_dimension_numbers<[1], [0], [0], [1], [0, 0, 1, 1], [], []>} : vector<16x384xbf16>, vector<384x128xbf16>, vector<16x128xf32> -> vector<16x128xf32>
    %c0_7 = arith.constant 0 : index
    %c0_8 = arith.constant 0 : index
    %13 = vector.load %arg4[%c0_7, %c0_8] : memref<1x128xf32, #tpu.memory_space<vmem>>, vector<1x128xf32>
    %14 = vector.broadcast %13 : vector<1x128xf32> to vector<16x128xf32>
    %15 = arith.mulf %12, %14 : vector<16x128xf32>
    %c0_9 = arith.constant 0 : index
    %c0_10 = arith.constant 0 : index
    %16 = vector.load %arg5[%c0_9, %c0_10] : memref<1x128xf32, #tpu.memory_space<vmem>>, vector<1x128xf32>
    %17 = vector.broadcast %16 : vector<1x128xf32> to vector<16x128xf32>
    %18 = arith.addf %15, %17 : vector<16x128xf32>
    %cst_11 = arith.constant 0.000000e+00 : f32
    %19 = vector.broadcast %cst_11 : f32 to vector<16x128xf32>
    %20 = arith.cmpf ogt, %18, %19 : vector<16x128xf32>
    %cst_12 = arith.constant 0.00999999977 : f32
    %21 = vector.broadcast %cst_12 : f32 to vector<16x128xf32>
    %22 = arith.mulf %21, %18 : vector<16x128xf32>
    %23 = arith.select %20, %18, %22 : vector<16x128xi1>, vector<16x128xf32>
    %24 = arith.truncf %23 : vector<16x128xf32> to vector<16x128xbf16>
    %c0_13 = arith.constant 0 : index
    %c0_14 = arith.constant 0 : index
    %25 = vector.load %arg13[%c0_13, %c0_14] : memref<8x128xbf16, #tpu.memory_space<vmem>>, vector<8x128xbf16>
    %26 = tpu.concatenate %25, %24 in 0 : vector<8x128xbf16>, vector<16x128xbf16> -> vector<24x128xbf16>
    %27 = vector.extract_strided_slice %26 {offsets = [6, 0], sizes = [16, 128], strides = [1, 1]} : vector<24x128xbf16> to vector<16x128xbf16>
    %28 = vector.extract_strided_slice %26 {offsets = [7, 0], sizes = [16, 128], strides = [1, 1]} : vector<24x128xbf16> to vector<16x128xbf16>
    %29 = vector.extract_strided_slice %26 {offsets = [8, 0], sizes = [16, 128], strides = [1, 1]} : vector<24x128xbf16> to vector<16x128xbf16>
    %30 = tpu.concatenate %27, %28, %29 in 1 : vector<16x128xbf16>, vector<16x128xbf16>, vector<16x128xbf16> -> vector<16x384xbf16>
    %c0_15 = arith.constant 0 : index
    %c0_16 = arith.constant 0 : index
    %31 = vector.load %arg6[%c0_15, %c0_16] : memref<384x128xbf16, #tpu.memory_space<vmem>>, vector<384x128xbf16>
    %cst_17 = arith.constant dense<0.000000e+00> : vector<16x128xf32>
    %32 = tpu.matmul %30, %31, %cst_17 {dimension_numbers = #tpu.dot_dimension_numbers<[1], [0], [0], [1], [0, 0, 1, 1], [], []>} : vector<16x384xbf16>, vector<384x128xbf16>, vector<16x128xf32> -> vector<16x128xf32>
    %c0_18 = arith.constant 0 : index
    %c0_19 = arith.constant 0 : index
    %33 = vector.load %arg7[%c0_18, %c0_19] : memref<1x128xf32, #tpu.memory_space<vmem>>, vector<1x128xf32>
    %34 = vector.broadcast %33 : vector<1x128xf32> to vector<16x128xf32>
    %35 = arith.mulf %32, %34 : vector<16x128xf32>
    %c0_20 = arith.constant 0 : index
    %c0_21 = arith.constant 0 : index
    %36 = vector.load %arg8[%c0_20, %c0_21] : memref<1x128xf32, #tpu.memory_space<vmem>>, vector<1x128xf32>
    %37 = vector.broadcast %36 : vector<1x128xf32> to vector<16x128xf32>
    %38 = arith.addf %35, %37 : vector<16x128xf32>
    %cst_22 = arith.constant 0.000000e+00 : f32
    %39 = vector.broadcast %cst_22 : f32 to vector<16x128xf32>
    %40 = arith.cmpf ogt, %38, %39 : vector<16x128xf32>
    %cst_23 = arith.constant 0.00999999977 : f32
    %41 = vector.broadcast %cst_23 : f32 to vector<16x128xf32>
    %42 = arith.mulf %41, %38 : vector<16x128xf32>
    %43 = arith.select %40, %38, %42 : vector<16x128xi1>, vector<16x128xf32>
    %c0_24 = arith.constant 0 : index
    %c0_25 = arith.constant 0 : index
    %44 = vector.load %arg9[%c0_24, %c0_25] : memref<128x128xbf16, #tpu.memory_space<vmem>>, vector<128x128xbf16>
    %cst_26 = arith.constant dense<0.000000e+00> : vector<16x128xf32>
    %45 = tpu.matmul %4, %44, %cst_26 {dimension_numbers = #tpu.dot_dimension_numbers<[1], [0], [0], [1], [0, 0, 1, 1], [], []>} : vector<16x128xbf16>, vector<128x128xbf16>, vector<16x128xf32> -> vector<16x128xf32>
    %c0_27 = arith.constant 0 : index
    %c0_28 = arith.constant 0 : index
    %46 = vector.load %arg10[%c0_27, %c0_28] : memref<1x128xf32, #tpu.memory_space<vmem>>, vector<1x128xf32>
    %47 = vector.broadcast %46 : vector<1x128xf32> to vector<16x128xf32>
    %48 = arith.addf %45, %47 : vector<16x128xf32>
    %49 = arith.addf %43, %48 : vector<16x128xf32>
    %cst_29 = arith.constant 0.000000e+00 : f32
    %50 = vector.broadcast %cst_29 : f32 to vector<16x128xf32>
    %51 = arith.maximumf %49, %50 : vector<16x128xf32>
    %52 = arith.truncf %51 : vector<16x128xf32> to vector<16x128xbf16>
    %c0_30 = arith.constant 0 : index
    %c0_31 = arith.constant 0 : index
    %c0_32 = arith.constant 0 : index
    %53 = vector.load %arg11[%c0_30, %c0_31, %c0_32] : memref<1x16x128xbf16, #tpu.memory_space<vmem>>, vector<1x16x128xbf16>
    %54 = vector.shape_cast %53 : vector<1x16x128xbf16> to vector<16x128xbf16>
    %55 = vector.shape_cast %52 : vector<16x128xbf16> to vector<1x16x128xbf16>
    tpu.vector_store %arg11[%c0_30, %c0_31, %c0_32], %55 {strides = array<i32>} : memref<1x16x128xbf16, #tpu.memory_space<vmem>>, vector<1x16x128xbf16>,
    return
  }
  func.func @transform_0(%arg0: i32, %arg1: i32) -> (i32, i32, i32) {
    %c0_i32 = arith.constant 0 : i32
    %c0_i32_0 = arith.constant 0 : i32
    return %arg0, %arg1, %c0_i32 : i32, i32, i32
  }
  func.func @transform_1(%arg0: i32, %arg1: i32) -> (i32, i32) {
    %c0_i32 = arith.constant 0 : i32
    %c0_i32_0 = arith.constant 0 : i32
    %c0_i32_1 = arith.constant 0 : i32
    return %c0_i32, %c0_i32_0 : i32, i32
  }
  func.func @transform_2(%arg0: i32, %arg1: i32) -> (i32, i32) {
    %c0_i32 = arith.constant 0 : i32
    %c0_i32_0 = arith.constant 0 : i32
    %c0_i32_1 = arith.constant 0 : i32
    return %c0_i32, %c0_i32_0 : i32, i32
  }
  func.func @transform_3(%arg0: i32, %arg1: i32) -> (i32, i32) {
    %c0_i32 = arith.constant 0 : i32
    %c0_i32_0 = arith.constant 0 : i32
    %c0_i32_1 = arith.constant 0 : i32
    return %c0_i32, %c0_i32_0 : i32, i32
  }
  func.func @transform_4(%arg0: i32, %arg1: i32) -> (i32, i32) {
    %c0_i32 = arith.constant 0 : i32
    %c0_i32_0 = arith.constant 0 : i32
    %c0_i32_1 = arith.constant 0 : i32
    return %c0_i32, %c0_i32_0 : i32, i32
  }
  func.func @transform_5(%arg0: i32, %arg1: i32) -> (i32, i32) {
    %c0_i32 = arith.constant 0 : i32
    %c0_i32_0 = arith.constant 0 : i32
    %c0_i32_1 = arith.constant 0 : i32
    return %c0_i32, %c0_i32_0 : i32, i32
  }
  func.func @transform_6(%arg0: i32, %arg1: i32) -> (i32, i32) {
    %c0_i32 = arith.constant 0 : i32
    %c0_i32_0 = arith.constant 0 : i32
    %c0_i32_1 = arith.constant 0 : i32
    return %c0_i32, %c0_i32_0 : i32, i32
  }
  func.func @transform_7(%arg0: i32, %arg1: i32) -> (i32, i32) {
    %c0_i32 = arith.constant 0 : i32
    %c0_i32_0 = arith.constant 0 : i32
    %c0_i32_1 = arith.constant 0 : i32
    return %c0_i32, %c0_i32_0 : i32, i32
  }
  func.func @transform_8(%arg0: i32, %arg1: i32) -> (i32, i32) {
    %c0_i32 = arith.constant 0 : i32
    %c0_i32_0 = arith.constant 0 : i32
    %c0_i32_1 = arith.constant 0 : i32
    return %c0_i32, %c0_i32_0 : i32, i32
  }
  func.func @transform_9(%arg0: i32, %arg1: i32) -> (i32, i32, i32) {
    %c0_i32 = arith.constant 0 : i32
    %c0_i32_0 = arith.constant 0 : i32
    return %arg0, %arg1, %c0_i32 : i32, i32, i32
  }
}

</mosaic_0001>

<bundles_post_ra>
// kernel: tpu_custom_call.1
= control target key start
LH: loop header
LB: loop body
LE: loop exit
PB: predicated region body
PF: predicated region fallthrough
CT: control target
= control target key end

     0   :  { %s2381_s0 = inlined_call_operand.hbm [shape: bf16[2,16,128], index: 0, kind: input, shape index: {}]   ;;  %s2382_s1 = inlined_call_operand.hbm [shape: bf16[384,128], index: 1, kind: input, shape index: {}]   ;;  %s2383_s2 = inlined_call_operand.vmem [shape: f32[1,128], index: 2, kind: input, shape index: {}]   ;;  %s2384_s3 = inlined_call_operand.vmem [shape: f32[1,128], index: 3, kind: input, shape index: {}]   ;;  %s2385_s4 = inlined_call_operand.hbm [shape: bf16[384,128], index: 4, kind: input, shape index: {}]   ;;  %s2386_s5 = inlined_call_operand.vmem [shape: f32[1,128], index: 5, kind: input, shape index: {}]   ;;  %s2387_s6 = inlined_call_operand.vmem [shape: f32[1,128], index: 6, kind: input, shape index: {}]   ;;  %s2388_s7 = inlined_call_operand.hbm [shape: bf16[128,128], index: 7, kind: input, shape index: {}]   ;;  %s2389_s8 = inlined_call_operand.vmem [shape: f32[1,128], index: 8, kind: input, shape index: {}]   ;;  %s2390_s9 = inlined_call_operand.hbm [shape: bf16[2,16,128], index: 9, kind: output, shape index: {}]  }
   0x1   :  { %2398 = sst [smem:[#allocation20_spill]] %s2387_s6 }
   0x2   :  { %2399 = sst [smem:[#allocation21_spill]] %s2389_s8 }
   0x3   :  { %2400 = sst [smem:[#allocation22_spill]] %s2390_s9 }
   0x4   :  { %14 = vsyncpa [#allocation5], 0 }
   0x5   :  { %16 = vsyncpa [#allocation5 + $0x1], 0 }
   0x6   :  { %17 = vsyncpa [#allocation8], 0 }
   0x7   :  { %18 = vsyncpa [#allocation11], 0 }
   0x8   :  { %19 = vsyncpa [#allocation6], 0 }
   0x9   :  { %21 = vsyncpa [#allocation6 + $0x1], 0  ;;  %s2014_s30 = smov 0   ;;  %s2016_s10 = smov 0  }
   0xa   :  { %s2018_s11 = smov 0   ;;  %s2020_s12 = smov 0  }
   0xb   :  { %s2022_s13 = smov 0   ;;  %s2024_s14 = smov 0  }
   0xc LB: > { %2401 = sst [smem:[#allocation17_spill]] %s1930_s30  ;;  %s1360_s15 = sadd.s32 4294967295, %s1950_s14   ;;  %s1950_s14 = sphi %s2024_s14, %s27_s14   ;;  %s1946_s13 = sphi %s2022_s13, %s2429_s13   ;;  %s1942_s12 = sphi %s2020_s12, %s2428_s12   ;;  %s1938_s11 = sphi %s2018_s11, %s2427_s11   ;;  %s1934_s10 = sphi %s2016_s10, %s2426_s10   ;;  %s1930_s30 = sphi %s2014_s30, %s2425_s30  }
   0xd   : > { %2402 = sst [smem:[#allocation18_spill]] %s1942_s12  ;;  %s1361_s16 = sadd.s32 4294967294, %s1950_s14  }
   0xe   : > { %p61_p0 = scmp.ne.s32.totalorder %s1934_s10, %s1930_s30  ;;  %p2048_p1 = scmp.eq.s32.totalorder %s1360_s15, 0 }
   0xf   : > { %p2052_p2 = scmp.eq.s32.totalorder %s1360_s15, 1  ;;  %p261_p3 = scmp.eq.s32.totalorder %s1361_s16, 1 }
  0x10   : > { %s2403_s17 = scalar_select %p2048_p1, 1, 0 }
  0x11   : > { %s2404_s18 = scalar_select %p2052_p2, 1, 0 }
  0x12   : > { %p2058_p4 = por %p2048_p1, %p61_p0  ;;  %p1362_p5 = scmp.ge.s32.totalorder %s1950_s14, 1 }
  0x13   : > { %p2063_p6 = por %p261_p3, %p61_p0  ;;  %p268_p7 = scmp.lt.s32.totalorder %s1950_s14, 3 }
  0x14   : > { %s2405_s19 = scalar_select %p2058_p4, 1, 0 }
  0x15   : > { %s2406_s20 = scalar_select %p2063_p6, 1, 0 }
  0x16   : > { %p2068_p8 = pnand %p1362_p5, %p268_p7  ;;  %s1952_s22 = smov [#allocation7]  }
  0x17   : > { %2407 = sst [smem:[#allocation19_spill]] %s2406_s20  ;;  %s280_s23 = sshll.u32 %s1952_s22, 4  ;;  %s2072_s23 = int_to_ptr.vmem [resolvable:$true] %s280_s23 }
  0x18   : > { %s2408_s21 = scalar_select %p2068_p8, 1, 0 }
  0x19   : > { %p1603_p9 = pneg %p2068_p8  ;;  %s1953_s25 = smov [#allocation9]  }
  0x1a   : > { %s299_s26 = sshll.u32 %s1953_s25, 4  ;;  %s1954_s27 = smov [#allocation10]   ;;  %s2083_s26 = int_to_ptr.vmem [resolvable:$true] %s299_s26 }
  0x1b   : > { %p2079_p11 = pnand %p1603_p9, %p2048_p1  ;;  %s2085_s28 = sshll.u32 %s1954_s27, 4  ;;  %s319_s28 = int_to_ptr.vmem [resolvable:$true] %s2085_s28 }
  0x1c   : > { %s1746_s16 = scalar_lea.hbm %s2382_s1, 3072 }
  0x1d   : > { %p1747_p12 = scmp.ne.s32.totalorder %s2382_s1, %s1746_s16  ;;  %p2095_p13 = pneg %p2079_p11 }
  0x1e   : > { %p1753_p5 = scmp.lt.u32.totalorder %s1746_s16, %s2382_s1 }
  0x1f   : > { %p1749_p0 = pnand %p2095_p13, %p1747_p12 }
  0x21   : > { %p1750_p3 = pneg %p1749_p0 }
  0x23   : > { %p1755_p7 = pnand %p1753_p5, %p1750_p3 }
  0x25   : > { %1758 = shalt.err (!%p1755_p7)
}
  0x26   : > { %s1759_s20 = scalar_lea.vmem %s2072_s23, 3072  ;;  %p1767_p1 = scmp.lt.s32.totalorder %s2072_s23, %s2072_s23 }
  0x27   : > { %p1760_p9 = scmp.ne.s32.totalorder %s2072_s23, %s1759_s20  ;;  %p1768_p4 = scmp.lt.s32.totalorder %s1759_s20, %s1759_s20 }
  0x29   : > { %p1762_p10 = pnand %p1760_p9, %p2095_p13  ;;  %p1769_p12 = por %p1768_p4, %p1767_p1 }
  0x2b   : > { %p1763_p6 = pneg %p1762_p10 }
  0x2d   : > { %p1770_p0 = pnand %p1769_p12, %p1763_p6 }
  0x2f   : > { %1773 = shalt.err (!%p1770_p0)
}
  0x30   : > { %s1955_s29 = smov 64   ;;  %s1956_s15 = smov 4  }
  0x31   : > { %1606 = dma.hbm_to_vmem [thread:$0]  (!%p2079_p11), %s2382_s1, 3072, %s2072_s23, [#allocation8], %s1955_s29, %s1955_s29, %s1956_s15  }
  0x32   : > { %s1774_s20 = scalar_lea.hbm %s2385_s4, 3072 }
  0x33   : > { %p1775_p1 = scmp.ne.s32.totalorder %s2385_s4, %s1774_s20  ;;  %p1781_p10 = scmp.lt.u32.totalorder %s1774_s20, %s2385_s4 }
  0x35   : > { %p1777_p4 = pnand %p1775_p1, %p2095_p13 }
  0x37   : > { %p1778_p6 = pneg %p1777_p4 }
  0x39   : > { %p1783_p3 = pnand %p1781_p10, %p1778_p6 }
  0x3b   : > { %1786 = shalt.err (!%p1783_p3)
}
  0x3c   : > { %s1787_s23 = scalar_lea.vmem %s2083_s26, 3072  ;;  %p1795_p12 = scmp.lt.s32.totalorder %s2083_s26, %s2083_s26 }
  0x3d   : > { %p1788_p5 = scmp.ne.s32.totalorder %s2083_s26, %s1787_s23  ;;  %p1796_p0 = scmp.lt.s32.totalorder %s1787_s23, %s1787_s23 }
  0x3f   : > { %p1790_p7 = pnand %p1788_p5, %p2095_p13  ;;  %p1797_p1 = por %p1796_p0, %p1795_p12 }
  0x41   : > { %p1791_p9 = pneg %p1790_p7 }
  0x43   : > { %p1798_p4 = pnand %p1797_p1, %p1791_p9 }
  0x45   : > { %1801 = shalt.err (!%p1798_p4)
}
  0x46   : > { %1609 = dma.hbm_to_vmem [thread:$0]  (!%p2079_p11), %s2385_s4, 3072, %s2083_s26, [#allocation8], %s1955_s29, %s1955_s29, %s1956_s15  }
  0x47   : > { %s1802_s16 = scalar_lea.hbm %s2388_s7, 1024 }
  0x48   : > { %p1803_p6 = scmp.ne.s32.totalorder %s2388_s7, %s1802_s16  ;;  %p1809_p5 = scmp.lt.u32.totalorder %s1802_s16, %s2388_s7 }
  0x4a   : > { %p1805_p10 = pnand %p1803_p6, %p2095_p13 }
  0x4c   : > { %p1806_p3 = pneg %p1805_p10 }
  0x4e   : > { %p1811_p7 = pnand %p1809_p5, %p1806_p3 }
  0x50   : > { %1814 = shalt.err (!%p1811_p7)
}
  0x51   : > { %s1815_s23 = scalar_lea.vmem %s319_s28, 1024  ;;  %p1823_p1 = scmp.lt.s32.totalorder %s319_s28, %s319_s28 }
  0x52   : > { %p1816_p9 = scmp.ne.s32.totalorder %s319_s28, %s1815_s23  ;;  %p1824_p4 = scmp.lt.s32.totalorder %s1815_s23, %s1815_s23 }
  0x54   : > { %p1818_p12 = pnand %p1816_p9, %p2095_p13  ;;  %p1825_p8 = por %p1824_p4, %p1823_p1 }
  0x56   : > { %p1819_p0 = pneg %p1818_p12 }
  0x58   : > { %p1826_p2 = pnand %p1825_p8, %p1819_p0 }
  0x5a   : > { %1829 = shalt.err (!%p1826_p2)
}
  0x5b   : > { %1612 = dma.hbm_to_vmem [thread:$0]  (!%p2079_p11), %s2388_s7, 1024, %s319_s28, [#allocation11], %s1955_s29, %s1955_s29, %s1956_s15  }
  0x5c   : > { %s48_s30 = sadd.s32 1, %s1938_s11  ;;  %s39_s24 = sadd.s32 1, %s1946_s13 }
  0x5d   : > { %p55_p2 = scmp.ne.s32.totalorder %s1938_s11, %s1934_s10  ;;  %p41_p8 = scmp.ge.s32.totalorder %s39_s24, 2 }
  0x5e   : > { %p56_p13 = scmp.eq.s32.totalorder %s1950_s14, 0  ;;  %p2411_p6 = scmp.ne.s32.totalorder %s2404_s18, 0 }
  0x5f   : > { %p1624_p3 = scmp.lt.s32.totalorder %s1950_s14, 2  ;;  %s2431_s24 = smov (%p41_p8, %s39_s24), 0 }
  0x60   : > { %p2174_p10 = por %p2411_p6, %p55_p2  ;;  %p57_p5 = por %p56_p13, %p55_p2 }
  0x61   : > { %s335_s9 = sand.u32 1, %s1938_s11   ;;  %s43_s12 = ssub.s32 %s1946_s13, %s2431_s24 }
  0x62   : > { %p46_p7 = scmp.eq.s32.totalorder %s43_s12, 0  ;;  %s1367_s28 = sshll.u32 %s335_s9, 3 }
  0x63   : > { %s1447_s16 = sshll.u32 %s1946_s13, 7  ;;  %s339_s20 = scalar_lea.vmem [#allocation4], %s1367_s28 }
  0x64   : > { %s2186_s22 = scalar_select %p46_p7, %s1938_s11, %s48_s30  }
  0x65   : > { %s2191_s18 = scalar_lea.hbm %s2381_s0, %s1447_s16  ;;  %s348_s23 = sshll.u32 %s339_s20, 4  ;;  %s2193_s23 = int_to_ptr.vmem [resolvable:$true] %s348_s23 }
  0x66   : > { %p2197_p11 = pnand %p1624_p3, %p57_p5  ;;  %s2201_s6 = scalar_lea.sflag [#allocation5], %s335_s9 }
  0x67   : > { %s1830_s30 = scalar_lea.hbm %s2191_s18, 128  ;;  %s1835_s16 = scalar_lea.hbm %s2381_s0, 256 }
  0x68   : > { %p1831_p9 = scmp.ne.s32.totalorder %s2191_s18, %s1830_s30  ;;  %p1832_p12 = pneg %p2197_p11 }
  0x69   : > { %p1836_p4 = scmp.lt.u32.totalorder %s2191_s18, %s2381_s0  ;;  %p1837_p2 = scmp.lt.u32.totalorder %s1835_s16, %s1830_s30 }
  0x6a   : > { %p1833_p0 = pnand %p1832_p12, %p1831_p9  ;;  %p1839_p13 = scmp.lt.u32.totalorder %s1830_s30, %s2191_s18 }
  0x6b   : > { %p1838_p8 = por %p1837_p2, %p1836_p4 }
  0x6c   : > { %p1834_p1 = pneg %p1833_p0 }
  0x6d   : > { %p1840_p6 = por %p1839_p13, %p1838_p8 }
  0x6f   : > { %p1841_p3 = pnand %p1840_p6, %p1834_p1 }
  0x71   : > { %1844 = shalt.err (!%p1841_p3)
}
  0x72   : > { %s1845_s9 = scalar_lea.vmem %s2193_s23, 128  ;;  %s1957_s20 = smov [#allocation4]  }
  0x73   : > { %p1846_p5 = scmp.ne.s32.totalorder %s2193_s23, %s1845_s9  ;;  %s1850_s12 = sshll.u32 %s1957_s20, 4  ;;  %s1851_s12 = int_to_ptr.vmem [resolvable:$false] %s1850_s12 }
  0x74   : > { %s1852_s28 = scalar_lea.vmem %s1851_s12, 256  ;;  %p1853_p0 = scmp.lt.s32.totalorder %s2193_s23, %s1851_s12 }
  0x75   : > { %p1848_p7 = pnand %p1846_p5, %p1832_p12  ;;  %p1854_p4 = scmp.lt.s32.totalorder %s1852_s28, %s1845_s9 }
  0x77   : > { %p1849_p9 = pneg %p1848_p7  ;;  %p1855_p2 = por %p1854_p4, %p1853_p0 }
  0x79   : > { %p1856_p8 = pnand %p1855_p2, %p1849_p9 }
  0x7b   : > { %1859 = shalt.err (!%p1856_p8)
}
  0x7c   : > { %1616 = dma.hbm_to_vmem [thread:$0]  (!%p2197_p11), %s2191_s18, 128, %s2193_s23, %s2201_s6, %s1955_s29, %s1955_s29, %s1956_s15  }
  0x7d   : > { %p2414_p12 = scmp.ne.s32.totalorder %s2408_s21, 0 }
  0x7e   : > { %s2235_s30 = sand.u32 (!%p2414_p12), 1, %s1934_s10   ;;  %p2415_p1 = scmp.ne.s32.totalorder (!%p2414_p12), %s2405_s19, 0 }
  0x7f   : > { %360 = sbr.rel (%p2414_p12) target bundleno = 685 (0x2ad), region = 56  ;;  %s1371_s16 = sshll.u32 (!%p2414_p12), %s2235_s30, 3 }
  0x80   : > { %s363_s25 = scalar_lea.sflag (!%p2414_p12), [#allocation5], %s2235_s30  ;;  %s2241_s26 = scalar_lea.vmem (!%p2414_p12), [#allocation4], %s1371_s16 }
  0x86   : > { %1913 = dma.done.wait (%p2415_p1), %s363_s25, 128  }
  0x87   : > { %1915 = vsyncadd (%p2415_p1), %s363_s25, 4294967168  ;;  %p2416_p11 = scmp.ne.s32.totalorder %s2403_s17, 0 }
  0x89   : > { %1917 = dma.done.wait (%p2416_p11), [#allocation8], 6144  }
  0x8a   : > { %1919 = vsyncadd (%p2416_p11), [#allocation8], 4294961152 }
  0x8b   : > { %1921 = dma.done.wait (%p2416_p11), [#allocation11], 1024  }
  0x8c   : > { %1923 = vsyncadd (%p2416_p11), [#allocation11], 4294966272  ;;  %v1958_v0 = vmov 0.0   ;;  %v1959_v1 = vmov 0   ;;  %vm1960_vm0 = vmmov 0   ;;  %v1687_v2 = vld [vmem:[#allocation7 + $0x40] sm:$0xff]  }
  0x8d   : > { %1527 = vmatprep.subr.bf16.mxu1 %v1958_v0  ;;  %420 = vst [vmem:[#allocation2] sm:$0xf] %v1959_v1  ;;  %421 = vst [vmem:[#allocation3] sm:$0xf] %v1959_v1  ;;  %1543 = vmatprep.mubr.msk.bf16.mxu1 %vm1960_vm0, %v1958_v0  ;;  %v1688_v3 = vld [vmem:[#allocation7] sm:$0xff]   ;;  %v1690_v5 = vld [vmem:[#allocation7 + $0x48] sm:$0xff]  }
  0x8e   : > { %1456 = vmatprep.subr.bf16.mxu0 %v1687_v2  ;;  %v1689_v4 = vld [vmem:[#allocation7 + $0x80] sm:$0xff]   ;;  %v1691_v6 = vld [vmem:[#allocation7 + $0x8] sm:$0xff]   ;;  %v1693_v8 = vld [vmem:[#allocation7 + $0x50] sm:$0xff]   ;;  %vm431_vm1 = vcmask 1043456   ;;  %vm435_vm2 = vsmask.f32 7424 }
  0x8f   : > { %1457 = vmatpush3.bf16.msra.mxu0 %v1688_v3  ;;  %1528 = vmatpush3.bf16.msra.mxu1 %v1689_v4  ;;  %v1692_v7 = vld [vmem:[#allocation7 + $0x88] sm:$0xff]   ;;  %v1694_v9 = vld [vmem:[#allocation7 + $0x10] sm:$0xff]   ;;  %v1696_v11 = vld [vmem:[#allocation7 + $0x58] sm:$0xff]   ;;  %vm503_vm3 = vcmask 1044480   ;;  %vm451_vm4 = vcmask 1046528   ;;  %s2417_s27 = sld [smem:[#allocation20_spill]] }
  0x90   : > { %1458 = vmatprep.subr.bf16.mxu0 %v1690_v5  ;;  %1529 = vmatprep.subr.bf16.mxu1 %v1958_v0  ;;  %v1695_v10 = vld [vmem:[#allocation7 + $0x90] sm:$0xff]   ;;  %v1697_v12 = vld [vmem:[#allocation7 + $0x18] sm:$0xff]   ;;  %v1699_v14 = vld [vmem:[#allocation7 + $0x60] sm:$0xff]   ;;  %s2418_s9 = sld [smem:[#allocation18_spill]]  ;;  %s2419_s28 = sld [smem:[#allocation21_spill]] }
  0x91   : > { %v1698_v13 = vld [vmem:[#allocation7 + $0x98] sm:$0xff]   ;;  %v1700_v15 = vld [vmem:[#allocation7 + $0x20] sm:$0xff]   ;;  %v1702_v17 = vld [vmem:[#allocation7 + $0x68] sm:$0xff]   ;;  %s2420_s29 = sld [smem:[#allocation22_spill]]  ;;  %s1229_s18 = scalar_lea.sflag [#allocation6], %s2235_s30 }
  0x92   : > { %v1701_v16 = vld [vmem:[#allocation7 + $0xa0] sm:$0xff]   ;;  %v1703_v18 = vld [vmem:[#allocation7 + $0x28] sm:$0xff]   ;;  %v1705_v20 = vld [vmem:[#allocation7 + $0x70] sm:$0xff]  }
  0x93   : > { %1459 = vmatpush3.bf16.msra.mxu0 %v1691_v6  ;;  %1530 = vmatpush3.bf16.msra.mxu1 %v1692_v7  ;;  %v1704_v19 = vld [vmem:[#allocation7 + $0xa8] sm:$0xff]   ;;  %v1706_v21 = vld [vmem:[#allocation7 + $0x30] sm:$0xff]   ;;  %v1708_v23 = vld [vmem:[#allocation7 + $0x78] sm:$0xff]  }
  0x94   : > { %1460 = vmatprep.subr.bf16.mxu0 %v1693_v8  ;;  %1531 = vmatprep.subr.bf16.mxu1 %v1958_v0  ;;  %v1707_v22 = vld [vmem:[#allocation7 + $0xb0] sm:$0xff]   ;;  %v424_v26 = vld [vmem:[#allocation2] sm:$0xf]  ;;  %v1709_v29 = vld [vmem:[#allocation7 + $0x38] sm:$0xff]  }
  0x95   : > { %v2264_v24 = vld [vmem:[%s2241_s26] sm:$0xf]  ;;  %v2267_v25 = vld [vmem:[%s2241_s26 + $0x4] sm:$0xf]  ;;  %v1714_v37 = vld [vmem:[#allocation9 + $0x40] sm:$0xff]   ;;  %s412_s26 = scalar_lea.vmem [#allocation12], %s1371_s16 }
  0x96   : > { %v1376_v27 = vcombine.low %v2264_v24, %v2264_v24  ;;  %v1377_v28 = vcombine.low %v2267_v25, %v2267_v25  ;;  %v1710_v30 = vld [vmem:[#allocation7 + $0xb8] sm:$0xff]   ;;  %v1713_v41 = vld [vmem:[#allocation9 + $0x80] sm:$0xff]   ;;  %v1716_v54 = vld [vmem:[#allocation9 + $0x88] sm:$0xff]   ;;  %s1450_s25 = sshll.u32 %s2418_s9, 7  ;;  %s1244_s17 = sshll.u32 %s412_s26, 4  ;;  %s2332_s17 = int_to_ptr.vmem [resolvable:$true] %s1244_s17 }
  0x97   : > { %1461 = vmatpush3.bf16.msra.mxu0 %v1694_v9  ;;  %1532 = vmatpush3.bf16.msra.mxu1 %v1695_v10  ;;  %v1715_v52 = vld [vmem:[#allocation9] sm:$0xff]   ;;  %v1717_v57 = vld [vmem:[#allocation9 + $0x48] sm:$0xff]   ;;  %v1719_v59 = vld [vmem:[#allocation9 + $0x90] sm:$0xff]   ;;  %s2330_s15 = scalar_lea.hbm %s2420_s29, %s1450_s25  ;;  %s1860_s23 = scalar_lea.vmem %s2332_s17, 128 }
  0x98   : > { %1462 = vmatprep.subr.bf16.mxu0 %v1696_v11  ;;  %1533 = vmatprep.subr.bf16.mxu1 %v1958_v0  ;;  %v434_v31 = vsel %vm431_vm1, %v424_v26, %v1376_v27  ;;  %v443_v32 = vshll.u32 %v1377_v28, 16  ;;  %v447_v33 = vshrl.u32 %v1377_v28, 16  ;;  %v453_v39 = vrot.slane %v1377_v28, 1  ;;  %v1718_v58 = vld [vmem:[#allocation9 + $0x8] sm:$0xff]   ;;  %v1720_v60 = vld [vmem:[#allocation9 + $0x50] sm:$0xff]   ;;  %v1722_v62 = vld [vmem:[#allocation9 + $0x98] sm:$0xff]   ;;  %p1861_p13 = scmp.ne.s32.totalorder %s2332_s17, %s1860_s23 }
  0x99   : > { %v436_v34 = vshrl.u32 %v434_v31, 16  ;;  %v438_v35 = vshll.u32 %v434_v31, 16  ;;  %v452_v36 = vrot.slane %v434_v31, 1  ;;  %v505_v43 = vrot.slane %v1377_v28, 3  ;;  %v1721_v61 = vld [vmem:[#allocation9 + $0x10] sm:$0xff]   ;;  %v1723_v63 = vld [vmem:[#allocation9 + $0x58] sm:$0xff]  }
  0x9a   : > { %v445_v38 = vrot.slane %v443_v32, 1  ;;  %v511_v45 = vrot.slane %v453_v39, 3  ;;  %v504_v47 = vrot.slane %v434_v31, 3  ;;  %v1724_v1 = vld [vmem:[#allocation9 + $0x18] sm:$0xff]   ;;  %v1725_v2 = vld [vmem:[#allocation9 + $0xa0] sm:$0xff]   ;;  %v1728_v5 = vld [vmem:[#allocation9 + $0xa8] sm:$0xff]   ;;  %p1862_p6 = pnand %p1861_p13, %p2174_p10 }
  0x9b   : > { %1463 = vmatpush3.bf16.msra.mxu0 %v1697_v12  ;;  %1534 = vmatpush3.bf16.msra.mxu1 %v1698_v13  ;;  %v440_v40 = vrot.slane %v438_v35, 1  ;;  %v454_v44 = vsel %vm451_vm4, %v452_v36, %v453_v39  ;;  %v1726_v3 = vld [vmem:[#allocation9 + $0x60] sm:$0xff]   ;;  %v1729_v6 = vld [vmem:[#allocation9 + $0x68] sm:$0xff]   ;;  %v1731_v8 = vld [vmem:[#allocation9 + $0xb0] sm:$0xff]   ;;  %s1961_s16 = smov [#allocation12]  }
  0x9c   : > { %1464 = vmatprep.subr.bf16.mxu0 %v1699_v14  ;;  %1535 = vmatprep.subr.bf16.mxu1 %v1958_v0  ;;  %v449_v42 = vor.u32 %v447_v33, %v445_v38  ;;  %v510_v48 = vrot.slane %v454_v44, 3  ;;  %v506_v55 = vsel %vm503_vm3, %v504_v47, %v505_v43  ;;  %v1727_v4 = vld [vmem:[#allocation9 + $0x20] sm:$0xff]   ;;  %v1730_v7 = vld [vmem:[#allocation9 + $0x28] sm:$0xff]   ;;  %v1732_v9 = vld [vmem:[#allocation9 + $0x70] sm:$0xff]   ;;  %p1863_p3 = pneg %p1862_p6  ;;  %s1864_s6 = sshll.u32 %s1961_s16, 4  ;;  %s1865_s6 = int_to_ptr.vmem [resolvable:$false] %s1864_s6 }
  0x9d   : > { %v441_v46 = vor.u32 %v440_v40, %v436_v34  ;;  %v1733_v10 = vld [vmem:[#allocation9 + $0x30] sm:$0xff]   ;;  %v1734_v11 = vld [vmem:[#allocation9 + $0xb8] sm:$0xff]   ;;  %v1403_v28 = vld [vmem:[%s2384_s3] ss:$0 sm:$0xff]  ;;  %p1867_p5 = scmp.lt.s32.totalorder %s2332_s17, %s1865_s6 }
  0x9e   : > { %v508_v49 = vrot.slane %v449_v42, 3  ;;  %v512_v51 = vsel %vm503_vm3, %v510_v48, %v511_v45  ;;  %v1735_v12 = vld [vmem:[#allocation9 + $0x78] sm:$0xff]   ;;  %v767_v39 = vld [vmem:[#allocation3] sm:$0xf] }
  0x9f   : > { %1465 = vmatpush3.bf16.msra.mxu0 %v1700_v15  ;;  %1536 = vmatpush3.bf16.msra.mxu1 %v1701_v16  ;;  %v446_v50 = vsel %vm435_vm2, %v441_v46, %v445_v38  ;;  %v1736_v13 = vld [vmem:[#allocation9 + $0x38] sm:$0xff]  }
  0xa0   : > { %1466 = vmatprep.subr.bf16.mxu0 %v1702_v17  ;;  %1537 = vmatprep.subr.bf16.mxu1 %v1958_v0  ;;  %v507_v53 = vrot.slane %v446_v50, 3 }
  0xa2   : > { %v509_v56 = vsel %vm503_vm3, %v507_v53, %v508_v49 }
  0xa3   : > { %1467 = vmatpush3.bf16.msra.mxu0 %v1703_v18  ;;  %1538 = vmatpush3.bf16.msra.mxu1 %v1704_v19 }
  0xa4   : > { %1468 = vmatprep.subr.bf16.mxu0 %v1705_v20  ;;  %1539 = vmatprep.subr.bf16.mxu1 %v1958_v0 }
  0xa5   : > { %692 = vmatprep.mubr.bf16.mxu0 %v509_v56 }
  0xa7   : > { %1469 = vmatpush3.bf16.msra.mxu0 %v1706_v21  ;;  %1540 = vmatpush3.bf16.msra.mxu1 %v1707_v22  ;;  %v1402_v22 = vld [vmem:[%s2383_s2] ss:$0 sm:$0xff] }
  0xa8   : > { %1470 = vmatprep.subr.bf16.mxu0 %v1708_v23  ;;  %1541 = vmatprep.subr.bf16.mxu1 %v1958_v0 }
  0xab   : > { %1471 = vmatpush3.bf16.msra.mxu0 %v1709_v29  ;;  %1542 = vmatpush3.bf16.msra.mxu1 %v1710_v30 }
  0xac   : > { %1487 = vmatprep.subr.bf16.mxu0 %v1714_v37  ;;  %1547 = vmatprep.subr.bf16.mxu1 %v1958_v0 }
  0xae   : > { %1544 = vmatmul.mubr.bf16.vlgmr.msra.gmra.mrb[0].mxu1 %v512_v51  ;;  %693 = vmatmul.mubr.bf16.vlgmr.msra.gmra.mrb[0].mxu0 %v506_v55 }
  0xaf   : > { %1548 = vmatpush3.bf16.msra.mxu1 %v1713_v41  ;;  %1563 = vmatprep.mubr.msk.bf16.mxu1 %vm1960_vm0, %v1958_v0 }
  0xb0   : > { %1549 = vmatprep.subr.bf16.mxu1 %v1958_v0  ;;  %1488 = vmatpush3.bf16.msra.mxu0 %v1715_v52 }
  0xb1   : > { %1489 = vmatprep.subr.bf16.mxu0 %v1717_v57 }
  0xb3   : > { %1550 = vmatpush3.bf16.msra.mxu1 %v1716_v54 }
  0xb4   : > { %1551 = vmatprep.subr.bf16.mxu1 %v1958_v0  ;;  %1490 = vmatpush3.bf16.msra.mxu0 %v1718_v58 }
  0xb5   : > { %1491 = vmatprep.subr.bf16.mxu0 %v1720_v60 }
  0xb7   : > { %1552 = vmatpush3.bf16.msra.mxu1 %v1719_v59 }
  0xb8   : > { %1553 = vmatprep.subr.bf16.mxu1 %v1958_v0  ;;  %1492 = vmatpush3.bf16.msra.mxu0 %v1721_v61  ;;  %v1737_v61 = vld [vmem:[#allocation10] sm:$0xff]  }
  0xb9   : > { %1493 = vmatprep.subr.bf16.mxu0 %v1723_v63 }
  0xbb   : > { %1554 = vmatpush3.bf16.msra.mxu1 %v1722_v62 }
  0xbc   : > { %1555 = vmatprep.subr.bf16.mxu1 %v1958_v0  ;;  %1494 = vmatpush3.bf16.msra.mxu0 %v1724_v1  ;;  %v1738_v1 = vld [vmem:[#allocation10 + $0x8] sm:$0xff]  }
  0xbd   : > { %1495 = vmatprep.subr.bf16.mxu0 %v1726_v3  ;;  %v1740_v3 = vld [vmem:[#allocation10 + $0x18] sm:$0xff]  }
  0xbf   : > { %1556 = vmatpush3.bf16.msra.mxu1 %v1725_v2  ;;  %v1739_v2 = vld [vmem:[#allocation10 + $0x10] sm:$0xff]  }
  0xc0   : > { %1557 = vmatprep.subr.bf16.mxu1 %v1958_v0  ;;  %1496 = vmatpush3.bf16.msra.mxu0 %v1727_v4  ;;  %v1741_v4 = vld [vmem:[#allocation10 + $0x20] sm:$0xff]  }
  0xc1   : > { %1497 = vmatprep.subr.bf16.mxu0 %v1729_v6  ;;  %v1743_v6 = vld [vmem:[#allocation10 + $0x30] sm:$0xff]  }
  0xc3   : > { %1558 = vmatpush3.bf16.msra.mxu1 %v1728_v5  ;;  %v1742_v5 = vld [vmem:[#allocation10 + $0x28] sm:$0xff]  }
  0xc4   : > { %1559 = vmatprep.subr.bf16.mxu1 %v1958_v0  ;;  %1498 = vmatpush3.bf16.msra.mxu0 %v1730_v7  ;;  %v1744_v7 = vld [vmem:[#allocation10 + $0x38] sm:$0xff]  }
  0xc5   : > { %1499 = vmatprep.subr.bf16.mxu0 %v1732_v9 }
  0xc7   : > { %1560 = vmatpush3.bf16.msra.mxu1 %v1731_v8  ;;  %v1431_v8 = vcombine.low %v2264_v24, %v2267_v25  ;;  %v1429_v24 = vld [vmem:[%s2417_s27] ss:$0 sm:$0xff]  ;;  %s1866_s27 = scalar_lea.vmem %s1865_s6, 256 }
  0xc8   : > { %1561 = vmatprep.subr.bf16.mxu1 %v1958_v0  ;;  %1500 = vmatpush3.bf16.msra.mxu0 %v1733_v10  ;;  %p1868_p7 = scmp.lt.s32.totalorder %s1866_s27, %s1860_s23 }
  0xc9   : > { %1501 = vmatprep.subr.bf16.mxu0 %v1735_v12 }
  0xca   : > { %p1869_p9 = por %p1868_p7, %p1867_p5 }
  0xcb   : > { %1562 = vmatpush3.bf16.msra.mxu1 %v1734_v11 }
  0xcc   : > { %1502 = vmatpush3.bf16.msra.mxu0 %v1736_v13  ;;  %p1870_p0 = pnand %p1869_p9, %p1863_p3 }
  0xcd   : > { %1567 = vmatprep.subr.bf16.mxu0 %v1958_v0 }
 0x181   : > { %v735_v14 = vpop.f32.mrb[0].mxu1  ;;  %v1472_v18 = vpop.f32.mrb[0].mxu0 }
 0x182   : > { %v1545_v15 = vpop.f32.mrb[1].mxu1  ;;  %v1473_v19 = vpop.f32.mrb[1].mxu0 }
 0x183   : > { %v738_v16 = vpop.f32.mrb[2].mxu1  ;;  %v1474_v20 = vadd.f32 %v1473_v19, %v1472_v18  ;;  %v1475_v21 = vpop.f32.mrb[2].mxu0 }
 0x184   : > { %v1546_v17 = vpop.f32.mrb[3].mxu1  ;;  %v1476_v23 = vpop.f32.mrb[3].mxu0 }
 0x185   : > { %v736_v26 = vadd.f32 %v1474_v20, %v735_v14  ;;  %v1477_v27 = vadd.f32 %v1476_v23, %v1475_v21 }
 0x187   : > { %v749_v29 = vmul.f32 %v1402_v22, %v736_v26  ;;  %v739_v30 = vadd.f32 %v1477_v27, %v738_v16  ;;  %v1430_v27 = vld [vmem:[%s2419_s28] ss:$0 sm:$0xff] }
 0x189   : > { %v758_v31 = vadd.f32 %v1403_v28, %v749_v29  ;;  %v750_v32 = vmul.f32 %v1402_v22, %v739_v30 }
 0x18b   : > { %v762_v33 = vmul.f32 0.01, %v758_v31  ;;  %v759_v34 = vadd.f32 %v1403_v28, %v750_v32  ;;  %vm760_vm5 = vcmp.gt.f32.partialorder %v758_v31, 0.0 }
 0x18d   : > { %vm761_vm6 = vcmp.gt.f32.partialorder %v759_v34, 0.0  ;;  %v763_v35 = vmul.f32 0.01, %v759_v34  ;;  %v764_v36 = vsel %vm760_vm5, %v758_v31, %v762_v33 }
 0x18f   : > { %v765_v37 = vsel %vm761_vm6, %v759_v34, %v763_v35 }
 0x190   : > { %v766_v38 = vpack.c.bf16 %v765_v37, %v764_v36 }
 0x192   : > { %v769_v40 = vrot.slane %v766_v38, 4 }
 0x194   : > { %v772_v41 = vsel %vm431_vm1, %v767_v39, %v769_v40  ;;  %v788_v42 = vrot.slane %v769_v40, 1  ;;  %v779_v43 = vshll.u32 %v769_v40, 16  ;;  %v783_v47 = vshrl.u32 %v769_v40, 16 }
 0x195   : > { %v787_v44 = vrot.slane %v772_v41, 1  ;;  %v775_v45 = vshll.u32 %v772_v41, 16  ;;  %v773_v49 = vshrl.u32 %v772_v41, 16  ;;  %v838_v57 = vrot.slane %v772_v41, 3 }
 0x196   : > { %v781_v46 = vrot.slane %v779_v43, 1  ;;  %v845_v52 = vrot.slane %v788_v42, 3  ;;  %v839_v58 = vrot.slane %v769_v40, 3 }
 0x197   : > { %v789_v48 = vsel %vm451_vm4, %v787_v44, %v788_v42  ;;  %v777_v50 = vrot.slane %v775_v45, 1 }
 0x198   : > { %v844_v51 = vrot.slane %v789_v48, 3  ;;  %v785_v53 = vor.u32 %v783_v47, %v781_v46  ;;  %v840_v63 = vsel %vm503_vm3, %v838_v57, %v839_v58 }
 0x199   : > { %v778_v54 = vor.u32 %v777_v50, %v773_v49 }
 0x19a   : > { %v846_v55 = vsel %vm503_vm3, %v844_v51, %v845_v52  ;;  %v842_v60 = vrot.slane %v785_v53, 3 }
 0x19b   : > { %1564 = vmatmul.mubr.bf16.vlgmr.msra.gmra.mrb[4].mxu1 %v846_v55  ;;  %v782_v56 = vsel %vm435_vm2, %v778_v54, %v781_v46 }
 0x19c   : > { %v841_v59 = vrot.slane %v782_v56, 3 }
 0x19e   : > { %v843_v62 = vsel %vm503_vm3, %v841_v59, %v842_v60 }
 0x19f   : > { %1026 = vmatprep.mubr.bf16.mxu0 %v843_v62 }
 0x1a0   : > { %1027 = vmatmul.mubr.bf16.vlgmr.msra.gmra.mrb[4].mxu0 %v840_v63 }
 0x1a1   : > { %1568 = vmatpush3.bf16.msra.mxu0 %v1737_v61  ;;  %1583 = vmatprep.mubr.msk.bf16.mxu0 %vm1960_vm0, %v1958_v0 }
 0x1a2   : > { %1569 = vmatprep.subr.bf16.mxu0 %v1958_v0 }
 0x1a5   : > { %1570 = vmatpush3.bf16.msra.mxu0 %v1738_v1 }
 0x1a6   : > { %1571 = vmatprep.subr.bf16.mxu0 %v1958_v0 }
 0x1a9   : > { %1572 = vmatpush3.bf16.msra.mxu0 %v1739_v2 }
 0x1aa   : > { %1573 = vmatprep.subr.bf16.mxu0 %v1958_v0 }
 0x1ad   : > { %1574 = vmatpush3.bf16.msra.mxu0 %v1740_v3 }
 0x1ae   : > { %1575 = vmatprep.subr.bf16.mxu0 %v1958_v0 }
 0x1b1   : > { %1576 = vmatpush3.bf16.msra.mxu0 %v1741_v4 }
 0x1b2   : > { %1577 = vmatprep.subr.bf16.mxu0 %v1958_v0 }
 0x1b5   : > { %1578 = vmatpush3.bf16.msra.mxu0 %v1742_v5 }
 0x1b6   : > { %1579 = vmatprep.subr.bf16.mxu0 %v1958_v0 }
 0x1b9   : > { %1580 = vmatpush3.bf16.msra.mxu0 %v1743_v6 }
 0x1ba   : > { %1581 = vmatprep.subr.bf16.mxu0 %v1958_v0  ;;  %v1428_v0 = vld [vmem:[%s2386_s5] ss:$0 sm:$0xff] }
 0x1bd   : > { %1582 = vmatpush3.bf16.msra.mxu0 %v1744_v7 }
 0x1c0   : > { %1584 = vmatmul.mubr.bf16.vlgmr.msra.gmra.mrb[8].mxu0 %v1431_v8 }
 0x26e   : > { %v1069_v9 = vpop.f32.mrb[4].mxu1 }
 0x26f   : > { %v1565_v10 = vpop.f32.mrb[5].mxu1 }
 0x270   : > { %v1072_v11 = vpop.f32.mrb[6].mxu1 }
 0x271   : > { %v1566_v12 = vpop.f32.mrb[7].mxu1 }
 0x273   : > { %v1503_v13 = vpop.f32.mrb[4].mxu0 }
 0x274   : > { %v1504_v14 = vpop.f32.mrb[5].mxu0 }
 0x275   : > { %v1505_v15 = vadd.f32 %v1504_v14, %v1503_v13  ;;  %v1506_v16 = vpop.f32.mrb[6].mxu0 }
 0x276   : > { %v1507_v17 = vpop.f32.mrb[7].mxu0 }
 0x277   : > { %v1070_v18 = vadd.f32 %v1505_v15, %v1069_v9  ;;  %v1508_v19 = vadd.f32 %v1507_v17, %v1506_v16 }
 0x279   : > { %v1073_v20 = vadd.f32 %v1508_v19, %v1072_v11  ;;  %v1083_v21 = vmul.f32 %v1428_v0, %v1070_v18 }
 0x27b   : > { %v1084_v25 = vmul.f32 %v1428_v0, %v1073_v20  ;;  %v1092_v22 = vadd.f32 %v1429_v24, %v1083_v21 }
 0x27d   : > { %v1093_v23 = vadd.f32 %v1429_v24, %v1084_v25  ;;  %v1096_v26 = vmul.f32 0.01, %v1092_v22  ;;  %vm1094_vm7 = vcmp.gt.f32.partialorder %v1092_v22, 0.0 }
 0x27f   : > { %v1097_v29 = vmul.f32 0.01, %v1093_v23  ;;  %vm1095_vm8 = vcmp.gt.f32.partialorder %v1093_v23, 0.0  ;;  %v1098_v32 = vsel %vm1094_vm7, %v1092_v22, %v1096_v26 }
 0x281   : > { %v1099_v37 = vsel %vm1095_vm8, %v1093_v23, %v1097_v29 }
 0x293   : > { %v1207_v28 = vpop.f32.mrb[8].mxu0 }
 0x294   : > { %v1208_v30 = vadd.f32 %v1430_v27, %v1207_v28  ;;  %v1585_v31 = vpop.f32.mrb[9].mxu0 }
 0x295   : > { %v1210_v33 = vpop.f32.mrb[10].mxu0 }
 0x296   : > { %v1214_v34 = vadd.f32 %v1208_v30, %v1098_v32  ;;  %v1211_v35 = vadd.f32 %v1430_v27, %v1210_v33  ;;  %v1586_v36 = vpop.f32.mrb[11].mxu0 }
 0x298   : > { %v1215_v38 = vadd.f32 %v1211_v35, %v1099_v37  ;;  %v1216_v39 = vmax.f32 %v1214_v34, 0.0 }
 0x29a   : > { %v1217_v40 = vmax.f32 %v1215_v38, 0.0 }
 0x29c   : > { %v1454_v41 = vpack.c.bf16 %v1217_v40, %v1216_v39 }
 0x29e   : > { %1455 = vst [vmem:[%s412_s26] sm:$0xff] %v1454_v41  }
 0x29f   : > { %1873 = shalt.err (!%p1870_p0)
}
 0x2a0   : > { %s1874_s9 = scalar_lea.hbm %s2330_s15, 128  ;;  %s1878_s28 = scalar_lea.hbm %s2420_s29, 256 }
 0x2a1   : > { %p1875_p4 = scmp.ne.s32.totalorder %s2330_s15, %s1874_s9  ;;  %p1879_p12 = scmp.lt.u32.totalorder %s2330_s15, %s2420_s29 }
 0x2a2   : > { %p1880_p1 = scmp.lt.u32.totalorder %s1878_s28, %s1874_s9  ;;  %p1882_p13 = scmp.lt.u32.totalorder %s1874_s9, %s2330_s15 }
 0x2a3   : > { %p1876_p2 = pnand %p1875_p4, %p2174_p10 }
 0x2a4   : > { %p1881_p11 = por %p1880_p1, %p1879_p12 }
 0x2a5   : > { %p1877_p8 = pneg %p1876_p2 }
 0x2a6   : > { %p1883_p6 = por %p1882_p13, %p1881_p11 }
 0x2a8   : > { %p1884_p3 = pnand %p1883_p6, %p1877_p8 }
 0x2aa   : > { %1887 = shalt.err (!%p1884_p3)
}
 0x2ab   : > { %s1962_s19 = smov 64   ;;  %s1963_s21 = smov 4  }
 0x2ac   : > { %1601 = dma.vmem_to_hbm [thread:$0]  (%p2174_p10), %s2332_s17, 128, %s2330_s15, %s1229_s18, %s1962_s19, %s1962_s19, %s1963_s21  }
 0x2ad PF: > { %s2421_s23 = sld [smem:[#allocation17_spill]]  ;;  %s2422_s16 = sld [smem:[#allocation19_spill]] }
 0x2ae   : > { %p2424_p7 = scmp.ge.s32.totalorder %s1950_s14, 2 }
 0x2b3   : > { %s1259_s6 = sand.u32 1, %s2421_s23   ;;  %p2423_p5 = scmp.ne.s32.totalorder %s2422_s16, 0 }
 0x2b4   : > { %s1260_s27 = scalar_lea.sflag [#allocation6], %s1259_s6 }
 0x2b5   : > { %p1618_p9 = pnand %p2424_p7, %p2423_p5 }
 0x2b7   : > { %1925 = dma.done.wait (!%p1618_p9), %s1260_s27, 128  }
 0x2b8   : > { %1927 = vsyncadd (!%p1618_p9), %s1260_s27, 4294967168  ;;  %s27_s14 = sadd.s32 1, %s1950_s14   ;;  %s2425_s30 = smov %s1934_s10 }
 0x2b9   : > { %p24_p0 = scmp.ge.s32.totalorder %s27_s14, 4   ;;  %s2426_s10 = smov %s1938_s11 }
 0x2ba   : > { %s2427_s11 = smov %s2186_s22  ;;  %s2428_s12 = smov %s1946_s13 }
 0x2bb   : > { %s2429_s13 = smov %s2431_s24  ;;  %26 = sbr.rel (!%p24_p0) target bundleno = 12 (0xc), region = 117 }
 0x2c2   :  { %1265 = vsyncpa [#allocation5], 1 }
 0x2c3   :  { %1267 = vsyncpa [#allocation5 + $0x1], 1 }
 0x2c4   :  { %1268 = vsyncpa [#allocation8], 1 }
 0x2c5   :  { %1269 = vsyncpa [#allocation11], 1 }
 0x2c6   :  { %1270 = vsyncpa [#allocation6], 1 }
 0x2c7   :  { %1272 = vsyncpa [#allocation6 + $0x1], 1 }

</bundles_post_ra>
